<compile_context>
chip_gen: v7x
topology: tpu7x:2x2x1
jax: 0.10.0
libtpu: 0.0.40
codegen_flags: <defaults>
</compile_context>

<pallas_src>
import functools

import jax
import jax.numpy as jnp
import numpy as np
from jax import lax
from jax.experimental import pallas as pl
from jax.experimental.pallas import tpu as pltpu

_ALLOWED_ACTS = (None, "relu", "tanh")
_DEFAULT_TILE_CAPS = (512, 512, 2048)  # (cap_m, cap_n, cap_k)


def _per_tc_vmem_bytes():
    """VMEM budget base, clamped to a safe per-TensorCore figure.

    v7x has 64 MiB per TensorCore and the query may report whole-chip capacity, so
    clamp to 64 MiB.  On v5e/v6e (128 MiB, single TC) the clamp is conservative, but
    the default tile caps need < 20 MiB double-buffered anyway.
    """
    try:
        cap = int(pltpu.get_tpu_info().vmem_capacity_bytes)
    except Exception:
        cap = 64 * 1024 * 1024
    return min(cap, 64 * 1024 * 1024)


def _choose_tiles(M, K, N, in_itemsize, out_itemsize, budget, caps):
    """Largest legal tiles whose double-buffered footprint fits the budget.

    Each dim uses its full extent when it is below the cap (a full-extent block is
    always a legal block size), otherwise a lane/sublane-aligned tile.  Shrink order:
    K first (fatter k steps), then N (floored at 256 for the 256-wide MXU), then M.
    """
    m_mult = max(8, 32 // in_itemsize)  # 8 f32, 16 bf16, 32 int8/fp8 sublane packing
    cap_m, cap_n, cap_k = caps

    def pick(cm, cn, ck):
        tm = M if M <= cm else max(m_mult, (cm // m_mult) * m_mult)
        tn = N if N <= cn else max(128, (cn // 128) * 128)
        tk = K if K <= ck else max(128, (ck // 128) * 128)
        return tm, tn, tk

    def est(tm, tn, tk):
        in_bytes = (tm * tk + tk * tn + tn) * in_itemsize      # x, w, bias tiles
        out_bytes = tm * tn * out_itemsize
        return 2 * (in_bytes + out_bytes) + tm * tn * 4        # double-buffered + f32 acc

    tm, tn, tk = pick(cap_m, cap_n, cap_k)
    while est(tm, tn, tk) > budget and cap_k > 256:
        cap_k //= 2
        tm, tn, tk = pick(cap_m, cap_n, cap_k)
    while est(tm, tn, tk) > budget and cap_n > 256:
        cap_n //= 2
        tm, tn, tk = pick(cap_m, cap_n, cap_k)
    while est(tm, tn, tk) > budget and cap_m > m_mult:
        cap_m //= 2
        tm, tn, tk = pick(cap_m, cap_n, cap_k)
    return tm, tn, tk, est(tm, tn, tk)


def _parallel_linear_kernel(x_ref, w_ref, b_ref, o_ref, acc_ref, *, act, k_axis, K, tk):
    # x_ref: (1, tm, tk), w_ref: (1, tk, tn), b_ref: (1, 1, tn),
    # o_ref: (1, tm, tn), acc_ref: (tm, tn) f32 scratch, resident across the k axis.
    k = pl.program_id(k_axis)

    @pl.when(k == 0)
    def _():
        acc_ref[...] = jnp.zeros_like(acc_ref)

    x_blk = x_ref[0]
    w_blk = w_ref[0]
    if K % tk != 0:
        # K tail: the out-of-bounds slice of the last K block holds undefined VMEM
        # contents; zero-mask BOTH operands so no garbage/NaN enters the accumulation.
        valid = K - k * tk  # >= tk on every step but the last
        kx = lax.broadcasted_iota(jnp.int32, x_blk.shape, 1)
        x_blk = jnp.where(kx < valid, x_blk, jnp.zeros_like(x_blk))
        kw = lax.broadcasted_iota(jnp.int32, w_blk.shape, 0)
        w_blk = jnp.where(kw < valid, w_blk, jnp.zeros_like(w_blk))

    acc_ref[...] += jnp.dot(x_blk, w_blk, preferred_element_type=jnp.float32)

    @pl.when(k == pl.num_programs(k_axis) - 1)
    def _():
        out = acc_ref[...] + b_ref[0].astype(jnp.float32)  # (1, tn) broadcast over tm
        if act == "relu":
            out = jnp.maximum(out, 0.0)
        elif act == "tanh":
            out = jnp.tanh(out)
        o_ref[0] = out.astype(o_ref.dtype)


def parallel_linear(x, weight, bias, act=None, compute_dtype=None, tile_caps=None):
    """x: (P, M, K), weight: (P, K, N), bias: (P, N) -> (P, M, N)."""
    if act not in _ALLOWED_ACTS:
        raise ValueError(f"Unsupported activation {act!r}; expected one of {_ALLOWED_ACTS}")
    P, M, K = x.shape
    Pw, Kw, N = weight.shape
    assert (Pw, Kw) == (P, K) and bias.shape == (P, N)

    out_dtype = x.dtype
    if compute_dtype is not None:
        # NOTE: for repeated (inference-style) calls, pre-cast `weight` persistently
        # outside this function -- the astype here is a full HBM read+write pass.
        x = x.astype(compute_dtype)
        weight = weight.astype(compute_dtype)

    in_isz = jnp.dtype(x.dtype).itemsize
    out_isz = jnp.dtype(out_dtype).itemsize

    per_tc = _per_tc_vmem_bytes()
    caps = tile_caps if tile_caps is not None else _DEFAULT_TILE_CAPS
    tm, tn, tk, est_bytes = _choose_tiles(
        M, K, N, in_isz, out_isz, budget=int(per_tc * 0.7), caps=caps
    )

    grid_m, grid_n, grid_k = pl.cdiv(M, tm), pl.cdiv(N, tn), pl.cdiv(K, tk)

    # Order the grid so the largest independent axis leads (v7x core split lands on it
    # even when P is 1 or odd); the K reduction stays innermost / "arbitrary".
    extents = {"p": P, "m": grid_m, "n": grid_n, "k": grid_k}
    axis_order = sorted(("p", "m", "n"), key=lambda a: -extents[a]) + ["k"]
    pos = {a: i for i, a in enumerate(axis_order)}
    grid = tuple(extents[a] for a in axis_order)

    def make_index_map(spec):
        def index_map(*gids):
            return tuple(gids[pos[s]] if isinstance(s, str) else s for s in spec)
        return index_map

    bias3 = bias.reshape(P, 1, N)  # block's second-to-last dim (1) == full dim -> legal

    flops = 2 * P * M * K * N
    transcendentals = P * M * N if act == "tanh" else 0
    bytes_accessed = int(
        grid_n * P * M * K * in_isz      # x re-streamed once per N tile
        + grid_m * P * K * N * in_isz    # weight re-streamed once per M tile
        + grid_m * P * N * in_isz        # bias
        + P * M * N * out_isz            # output written once
    )

    vmem_limit = int(min(per_tc * 0.95, max(2 * est_bytes, 32 * 1024 * 1024)))

    kernel = functools.partial(
        _parallel_linear_kernel, act=act, k_axis=pos["k"], K=K, tk=tk
    )
    out = pl.pallas_call(
        kernel,
        out_shape=jax.ShapeDtypeStruct((P, M, N), out_dtype),
        grid_spec=pltpu.PrefetchScalarGridSpec(
            num_scalar_prefetch=0,
            grid=grid,
            in_specs=[
                # TODO(synk): for tiny-M (GEMV-like) shapes, pipeline_mode=pl.Buffered(3)
                # on the weight spec would further hide DMA latency.
                pl.BlockSpec((1, tm, tk), make_index_map(("p", "m", "k"))),
                pl.BlockSpec((1, tk, tn), make_index_map(("p", "k", "n"))),
                pl.BlockSpec((1, 1, tn), make_index_map(("p", 0, "n"))),
            ],
            out_specs=pl.BlockSpec((1, tm, tn), make_index_map(("p", "m", "n"))),
            scratch_shapes=[pltpu.VMEM((tm, tn), jnp.float32)],
        ),
        compiler_params=pltpu.CompilerParams(
            dimension_semantics=("parallel", "parallel", "parallel", "arbitrary"),
            vmem_limit_bytes=vmem_limit,
        ),
        cost_estimate=pl.CostEstimate(
            flops=flops,
            transcendentals=transcendentals,
            bytes_accessed=bytes_accessed,
        ),
    )(x, weight, bias3)
    return out


def init_parallel_linear_params(key, n_parallel, in_features, out_features,
                                random_bias=False, dtype=jnp.float32):
    """Matches PyTorch __init__: weight ~ N(0, sqrt(2/in_features)), bias zeros (or normal)."""
    kw, kb = jax.random.split(key)
    std = np.sqrt(2.0 / in_features)
    weight = (jax.random.normal(kw, (n_parallel, in_features, out_features)) * std).astype(dtype)
    if random_bias:
        bias = (jax.random.normal(kb, (n_parallel, out_features)) * std).astype(dtype)
    else:
        bias = jnp.zeros((n_parallel, out_features), dtype=dtype)
    return weight, bias


if __name__ == "__main__":
    key = jax.random.PRNGKey(0)
    kx, kp, kx2, kp2 = jax.random.split(key, 4)

    # --- Test 1: small shapes consistent with the module (full-dim tiles). ---
    n_parallel, seq, in_features, out_features = 4, 8, 32, 32
    x = jax.random.normal(kx, (n_parallel, seq, in_features), dtype=jnp.float32)
    weight, bias = init_parallel_linear_params(
        kp, n_parallel, in_features, out_features, random_bias=True
    )

    out = jax.block_until_ready(parallel_linear(x, weight, bias, act="relu"))
    ref = jnp.einsum("pmk,pkn->pmn", x, weight,
                     precision=lax.Precision.HIGHEST) + bias[:, None, :]
    ref = jnp.maximum(ref, 0.0)
    np.testing.assert_allclose(np.asarray(out), np.asarray(ref), rtol=1e-5, atol=1e-5)

    # bf16-operand / f32-accumulate path (MXU-friendly); looser tolerance.
    out_bf16 = jax.block_until_ready(
        parallel_linear(x, weight, bias, act="relu", compute_dtype=jnp.bfloat16)
    )
    np.testing.assert_allclose(np.asarray(out_bf16), np.asarray(ref), rtol=5e-2, atol=5e-2)

    # --- Test 2: force tiny tile caps to exercise partial M/N tiles and the in-kernel
    # K-tail masking (no wrapper-side padding anywhere). ---
    P2, M2, K2, N2 = 2, 16, 200, 160
    x2 = jax.random.normal(kx2, (P2, M2, K2), dtype=jnp.float32)
    w2, b2 = init_parallel_linear_params(kp2, P2, K2, N2, random_bias=True)
    out2 = jax.block_until_ready(
        parallel_linear(x2, w2, b2, act="tanh", tile_caps=(8, 128, 128))
    )
    ref2 = jnp.tanh(jnp.einsum("pmk,pkn->pmn", x2, w2,
                               precision=lax.Precision.HIGHEST) + b2[:, None, :])
    np.testing.assert_allclose(np.asarray(out2), np.asarray(ref2), rtol=1e-5, atol=1e-4)

    # TODO(synk): PyTorch allows an arbitrary callable `act`; only None/"relu"/"tanh" here.
    print("KERNEL_OK")
</pallas_src>

<mosaic_0001>
module attributes {stable_mosaic.version = 11 : i64} {
  func.func @_parallel_linear_kernel(%arg0: i32, %arg1: i32, %arg2: i32, %arg3: i32, %arg4: memref<1x8x32xf32, #tpu.memory_space<vmem>>, %arg5: memref<1x32x32xf32, #tpu.memory_space<vmem>>, %arg6: memref<1x1x32xf32, #tpu.memory_space<vmem>>, %arg7: memref<1x8x32xf32, #tpu.memory_space<vmem>>, %arg8: memref<8x32xf32, #tpu.memory_space<vmem>>) attributes {dimension_semantics = [#tpu.dimension_semantics<parallel>, #tpu.dimension_semantics<parallel>, #tpu.dimension_semantics<parallel>, #tpu.dimension_semantics<arbitrary>], iteration_bounds = array<i64: 4, 1, 1, 1>, scalar_prefetch = 0 : i64, scratch_operands = 1 : i64, tpu.core_type = #tpu.core_type<tc>, window_params = [{transform_indices = @transform_0, window_bounds = array<i64: 1, 8, 32>}, {transform_indices = @transform_1, window_bounds = array<i64: 1, 32, 32>}, {transform_indices = @transform_2, window_bounds = array<i64: 1, 1, 32>}, {transform_indices = @transform_3, window_bounds = array<i64: 1, 8, 32>}]} {
    %c0_i32 = arith.constant 0 : i32
    %0 = arith.cmpi eq, %arg3, %c0_i32 : i32
    %1 = arith.extui %0 : i1 to i32
    %c0_i32_0 = arith.constant 0 : i32
    %2 = arith.cmpi ne, %1, %c0_i32_0 : i32
    scf.if %2 {
      %cst_12 = arith.constant 0.000000e+00 : f32
      %14 = vector.broadcast %cst_12 : f32 to vector<8x32xf32>
      %c0_13 = arith.constant 0 : index
      %c0_14 = arith.constant 0 : index
      %15 = vector.load %arg8[%c0_13, %c0_14] : memref<8x32xf32, #tpu.memory_space<vmem>>, vector<8x32xf32>
      tpu.vector_store %arg8[%c0_13, %c0_14], %14 {strides = array<i32>} : memref<8x32xf32, #tpu.memory_space<vmem>>, vector<8x32xf32>,
    } else {
    }
    %c0 = arith.constant 0 : index
    %c0_1 = arith.constant 0 : index
    %c0_2 = arith.constant 0 : index
    %3 = vector.load %arg4[%c0, %c0_1, %c0_2] : memref<1x8x32xf32, #tpu.memory_space<vmem>>, vector<1x8x32xf32>
    %4 = vector.shape_cast %3 : vector<1x8x32xf32> to vector<8x32xf32>
    %c0_3 = arith.constant 0 : index
    %c0_4 = arith.constant 0 : index
    %c0_5 = arith.constant 0 : index
    %5 = vector.load %arg5[%c0_3, %c0_4, %c0_5] : memref<1x32x32xf32, #tpu.memory_space<vmem>>, vector<1x32x32xf32>
    %6 = vector.shape_cast %5 : vector<1x32x32xf32> to vector<32x32xf32>
    %c0_6 = arith.constant 0 : index
    %c0_7 = arith.constant 0 : index
    %7 = vector.load %arg8[%c0_6, %c0_7] : memref<8x32xf32, #tpu.memory_space<vmem>>, vector<8x32xf32>
    %cst = arith.constant dense<0.000000e+00> : vector<8x32xf32>
    %8 = tpu.matmul %4, %6, %cst {dimension_numbers = #tpu.dot_dimension_numbers<[1], [0], [0], [1], [0, 0, 1, 1], [], []>} : vector<8x32xf32>, vector<32x32xf32>, vector<8x32xf32> -> vector<8x32xf32>
    %9 = arith.addf %7, %8 : vector<8x32xf32>
    %c0_8 = arith.constant 0 : index
    %c0_9 = arith.constant 0 : index
    %10 = vector.load %arg8[%c0_8, %c0_9] : memref<8x32xf32, #tpu.memory_space<vmem>>, vector<8x32xf32>
    tpu.vector_store %arg8[%c0_8, %c0_9], %9 {strides = array<i32>} : memref<8x32xf32, #tpu.memory_space<vmem>>, vector<8x32xf32>,
    %c0_i32_10 = arith.constant 0 : i32
    %11 = arith.cmpi eq, %arg3, %c0_i32_10 : i32
    %12 = arith.extui %11 : i1 to i32
    %c0_i32_11 = arith.constant 0 : i32
    %13 = arith.cmpi ne, %12, %c0_i32_11 : i32
    scf.if %13 {
      %c0_12 = arith.constant 0 : index
      %c0_13 = arith.constant 0 : index
      %14 = vector.load %arg8[%c0_12, %c0_13] : memref<8x32xf32, #tpu.memory_space<vmem>>, vector<8x32xf32>
      %c0_14 = arith.constant 0 : index
      %c0_15 = arith.constant 0 : index
      %c0_16 = arith.constant 0 : index
      %15 = vector.load %arg6[%c0_14, %c0_15, %c0_16] : memref<1x1x32xf32, #tpu.memory_space<vmem>>, vector<1x1x32xf32>
      %16 = vector.shape_cast %15 : vector<1x1x32xf32> to vector<1x32xf32>
      %17 = vector.broadcast %16 : vector<1x32xf32> to vector<8x32xf32>
      %18 = arith.addf %14, %17 : vector<8x32xf32>
      %cst_17 = arith.constant 0.000000e+00 : f32
      %19 = vector.broadcast %cst_17 : f32 to vector<8x32xf32>
      %20 = arith.maximumf %18, %19 : vector<8x32xf32>
      %c0_18 = arith.constant 0 : index
      %c0_19 = arith.constant 0 : index
      %c0_20 = arith.constant 0 : index
      %21 = vector.load %arg7[%c0_18, %c0_19, %c0_20] : memref<1x8x32xf32, #tpu.memory_space<vmem>>, vector<1x8x32xf32>
      %22 = vector.shape_cast %21 : vector<1x8x32xf32> to vector<8x32xf32>
      %23 = vector.shape_cast %20 : vector<8x32xf32> to vector<1x8x32xf32>
      tpu.vector_store %arg7[%c0_18, %c0_19, %c0_20], %23 {strides = array<i32>} : memref<1x8x32xf32, #tpu.memory_space<vmem>>, vector<1x8x32xf32>,
    } else {
    }
    return
  }
  func.func @transform_0(%arg0: i32, %arg1: i32, %arg2: i32, %arg3: i32) -> (i32, i32, i32) {
    %c0_i32 = arith.constant 0 : i32
    return %arg0, %arg1, %arg3 : i32, i32, i32
  }
  func.func @transform_1(%arg0: i32, %arg1: i32, %arg2: i32, %arg3: i32) -> (i32, i32, i32) {
    %c0_i32 = arith.constant 0 : i32
    return %arg0, %arg3, %arg2 : i32, i32, i32
  }
  func.func @transform_2(%arg0: i32, %arg1: i32, %arg2: i32, %arg3: i32) -> (i32, i32, i32) {
    %c0_i32 = arith.constant 0 : i32
    %c0_i32_0 = arith.constant 0 : i32
    return %arg0, %c0_i32, %arg2 : i32, i32, i32
  }
  func.func @transform_3(%arg0: i32, %arg1: i32, %arg2: i32, %arg3: i32) -> (i32, i32, i32) {
    %c0_i32 = arith.constant 0 : i32
    return %arg0, %arg1, %arg2 : i32, i32, i32
  }
}

</mosaic_0001>

<bundles_post_ra>
// kernel: tpu_custom_call.1
= control target key start
LH: loop header
LB: loop body
LE: loop exit
PB: predicated region body
PF: predicated region fallthrough
CT: control target
= control target key end

     0   :  { %8 = vsyncpa [#allocation4], 0  ;;  %s1064_s0 = inlined_call_operand.hbm [shape: f32[4,8,32], index: 0, kind: input, shape index: {}]   ;;  %s1065_s1 = inlined_call_operand.hbm [shape: f32[4,32,32], index: 1, kind: input, shape index: {}]   ;;  %s1066_s2 = inlined_call_operand.vmem [shape: f32[4,1,32], index: 2, kind: input, shape index: {}]   ;;  %s1067_s3 = inlined_call_operand.hbm [shape: f32[4,8,32], index: 3, kind: output, shape index: {}]  }
   0x1   :  { %10 = vsyncpa [#allocation4 + $0x1], 0 }
   0x2   :  { %11 = vsyncpa [#allocation7], 0 }
   0x3   :  { %13 = vsyncpa [#allocation7 + $0x1], 0 }
   0x4   :  { %14 = vsyncpa [#allocation5], 0 }
   0x5   :  { %16 = vsyncpa [#allocation5 + $0x1], 0  ;;  %s830_s12 = smov 0   ;;  %s832_s13 = smov 0  }
   0x6   :  { %s834_s14 = smov 0   ;;  %s836_s15 = smov 0  }
   0x7   :  { %s838_s16 = smov 0   ;;  %s840_s17 = smov 0  }
   0x8 LB: > { %s540_s18 = sadd.s32 4294967295, %s800_s17   ;;  %s541_s19 = sadd.s32 4294967294, %s800_s17   ;;  %s800_s17 = sphi %s840_s17, %s22_s17   ;;  %s796_s16 = sphi %s838_s16, %s1085_s16   ;;  %s792_s15 = sphi %s836_s15, %s1084_s15   ;;  %s788_s14 = sphi %s834_s14, %s1083_s14   ;;  %s784_s13 = sphi %s832_s13, %s1082_s13   ;;  %s780_s12 = sphi %s830_s12, %s1081_s12  }
   0x9   : > { %s48_s20 = sadd.s32 1, %s796_s16  ;;  %s59_s21 = sadd.s32 1, %s788_s14 }
   0xa   : > { %p50_p0 = scmp.ge.s32.totalorder %s48_s20, 4  ;;  %p66_p1 = scmp.ne.s32.totalorder %s788_s14, %s784_s13 }
   0xb   : > { %p67_p2 = scmp.eq.s32.totalorder %s800_s17, 0  ;;  %p72_p3 = scmp.ne.s32.totalorder %s784_s13, %s780_s12 }
   0xc   : > { %s1087_s20 = smov (%p50_p0, %s48_s20), 0  ;;  %p73_p5 = scmp.eq.s32.totalorder %s540_s18, 0 }
   0xd   : > { %p871_p4 = por %p67_p2, %p66_p1  ;;  %s52_s23 = ssub.s32 %s796_s16, %s1087_s20 }
   0xe   : > { %p158_p6 = scmp.eq.s32.totalorder %s540_s18, 3  ;;  %p57_p7 = scmp.eq.s32.totalorder %s52_s23, 0 }
   0xf   : > { %p877_p8 = por %p73_p5, %p72_p3  ;;  %p164_p10 = scmp.eq.s32.totalorder %s541_s19, 3 }
  0x10   : > { %p881_p9 = por %p158_p6, %p66_p1  ;;  %p599_p12 = scmp.lt.s32.totalorder %s800_s17, 4 }
  0x11   : > { %s1071_s24 = scalar_select %p877_p8, 1, 0 }
  0x12   : > { %s1072_s25 = scalar_select %p881_p9, 1, 0 }
  0x13   : > { %s886_s26 = scalar_select %p57_p7, %s788_s14, %s59_s21  }
  0x14   : > { %p888_p11 = por %p164_p10, %p72_p3  ;;  %s894_s28 = sand.u32 1, %s788_s14  }
  0x15   : > { %s544_s29 = sshll.u32 %s894_s28, 3  ;;  %s545_s30 = sshll.u32 %s796_s16, 7 }
  0x16   : > { %s1073_s27 = scalar_select %p888_p11, 1, 0 }
  0x17   : > { %s901_s6 = scalar_lea.hbm %s1064_s0, %s545_s30  ;;  %s188_s7 = scalar_lea.vmem [#allocation3], %s544_s29 }
  0x18   : > { %s197_s8 = sshll.u32 %s188_s7, 4  ;;  %p907_p13 = pnand %p599_p12, %p871_p4  ;;  %s903_s8 = int_to_ptr.vmem [resolvable:$true] %s197_s8 }
  0x19   : > { %s185_s10 = scalar_lea.sflag [#allocation4], %s894_s28  ;;  %s654_s11 = scalar_lea.hbm %s901_s6, 128 }
  0x1a   : > { %p655_p2 = scmp.ne.s32.totalorder %s901_s6, %s654_s11  ;;  %p656_p3 = pneg %p907_p13 }
  0x1b   : > { %s659_s21 = scalar_lea.hbm %s1064_s0, 512  ;;  %p660_p4 = scmp.lt.u32.totalorder %s901_s6, %s1064_s0 }
  0x1c   : > { %p657_p5 = pnand %p656_p3, %p655_p2  ;;  %p661_p7 = scmp.lt.u32.totalorder %s659_s21, %s654_s11 }
  0x1d   : > { %p663_p12 = scmp.lt.u32.totalorder %s654_s11, %s901_s6 }
  0x1e   : > { %p658_p6 = pneg %p657_p5  ;;  %p662_p10 = por %p661_p7, %p660_p4 }
  0x20   : > { %p664_p0 = por %p663_p12, %p662_p10 }
  0x22   : > { %p665_p1 = pnand %p664_p0, %p658_p6 }
  0x24   : > { %668 = shalt.err (!%p665_p1)
}
  0x25   : > { %s669_s29 = scalar_lea.vmem %s903_s8, 128  ;;  %s802_s30 = smov [#allocation3]  }
  0x26   : > { %p670_p2 = scmp.ne.s32.totalorder %s903_s8, %s669_s29  ;;  %s674_s4 = sshll.u32 %s802_s30, 4  ;;  %s675_s4 = int_to_ptr.vmem [resolvable:$false] %s674_s4 }
  0x27   : > { %s676_s5 = scalar_lea.vmem %s675_s4, 256  ;;  %p677_p9 = scmp.lt.s32.totalorder %s903_s8, %s675_s4 }
  0x28   : > { %p672_p5 = pnand %p670_p2, %p656_p3  ;;  %p678_p4 = scmp.lt.s32.totalorder %s676_s5, %s669_s29 }
  0x2a   : > { %p673_p11 = pneg %p672_p5  ;;  %p679_p7 = por %p678_p4, %p677_p9 }
  0x2c   : > { %p680_p10 = pnand %p679_p7, %p673_p11 }
  0x2e   : > { %683 = shalt.err (!%p680_p10)
}
  0x2f   : > { %591 = dma.hbm_to_vmem [thread:$0]  (!%p907_p13), %s901_s6, 128, %s903_s8, %s185_s10  }
  0x30   : > { %p1075_p0 = scmp.lt.s32.totalorder %s800_s17, 5  ;;  %p1076_p1 = scmp.ge.s32.totalorder %s800_s17, 1 }
  0x31   : > { %s546_s11 = sshll.u32 %s894_s28, 5  ;;  %s559_s18 = sshll.u32 %s796_s16, 9 }
  0x32   : > { %p943_p6 = pnand %p1076_p1, %p1075_p0  ;;  %s952_s22 = scalar_lea.hbm %s1065_s1, %s559_s18 }
  0x33   : > { %s208_s23 = scalar_lea.vmem [#allocation6], %s546_s11  ;;  %s205_s6 = scalar_lea.sflag [#allocation7], %s894_s28 }
  0x34   : > { %s218_s29 = sshll.u32 %s208_s23, 4  ;;  %s684_s8 = scalar_lea.hbm %s952_s22, 512  ;;  %s954_s29 = int_to_ptr.vmem [resolvable:$true] %s218_s29 }
  0x35   : > { %p685_p9 = scmp.ne.s32.totalorder %s952_s22, %s684_s8  ;;  %s689_s4 = scalar_lea.hbm %s1065_s1, 2048 }
  0x36   : > { %p690_p2 = scmp.lt.u32.totalorder %s952_s22, %s1065_s1  ;;  %p691_p5 = scmp.lt.u32.totalorder %s689_s4, %s684_s8 }
  0x37   : > { %p687_p11 = pnand %p685_p9, %p656_p3  ;;  %p693_p7 = scmp.lt.u32.totalorder %s684_s8, %s952_s22 }
  0x38   : > { %p692_p4 = por %p691_p5, %p690_p2 }
  0x39   : > { %p688_p12 = pneg %p687_p11 }
  0x3a   : > { %p694_p10 = por %p693_p7, %p692_p4 }
  0x3c   : > { %p695_p0 = pnand %p694_p10, %p688_p12 }
  0x3e   : > { %698 = shalt.err (!%p695_p0)
}
  0x3f   : > { %s699_s11 = scalar_lea.vmem %s954_s29, 512  ;;  %s803_s19 = smov [#allocation6]  }
  0x40   : > { %p700_p1 = scmp.ne.s32.totalorder %s954_s29, %s699_s11  ;;  %s704_s21 = sshll.u32 %s803_s19, 4  ;;  %s705_s21 = int_to_ptr.vmem [resolvable:$false] %s704_s21 }
  0x41   : > { %s706_s23 = scalar_lea.vmem %s705_s21, 1024  ;;  %p707_p8 = scmp.lt.s32.totalorder %s954_s29, %s705_s21 }
  0x42   : > { %p702_p9 = pnand %p700_p1, %p656_p3  ;;  %p708_p2 = scmp.lt.s32.totalorder %s706_s23, %s699_s11 }
  0x44   : > { %p703_p11 = pneg %p702_p9  ;;  %p709_p5 = por %p708_p2, %p707_p8 }
  0x46   : > { %p710_p4 = pnand %p709_p5, %p703_p11 }
  0x48   : > { %713 = shalt.err (!%p710_p4)
}
  0x49   : > { %s804_s8 = smov 128   ;;  %s805_s10 = smov 8  }
  0x4a   : > { %594 = dma.hbm_to_vmem [thread:$0]  (!%p907_p13), %s952_s22, 512, %s954_s29, %s205_s6, %s804_s8, %s804_s8, %s805_s10  }
  0x4b   : > { %239 = sbr.rel (%p943_p6) target bundleno = 337 (0x151), region = 32  ;;  %s985_s30 = sand.u32 (!%p943_p6), 1, %s784_s13  }
  0x4c   : > { %s550_s4 = sshll.u32 (!%p943_p6), %s985_s30, 3  ;;  %s242_s5 = scalar_lea.sflag (!%p943_p6), [#allocation4], %s985_s30 }
  0x4d   : > { %s245_s18 = scalar_lea.vmem (!%p943_p6), [#allocation3], %s550_s4  ;;  %p1078_p8 = scmp.ne.s32.totalorder (!%p943_p6), %s1071_s24, 0 }
  0x52   : > { %767 = dma.done.wait (%p1078_p8), %s242_s5, 128  }
  0x53   : > { %769 = vsyncadd (%p1078_p8), %s242_s5, 4294967168  ;;  %s551_s28 = sshll.u32 %s985_s30, 5  ;;  %s251_s9 = scalar_lea.sflag [#allocation7], %s985_s30 }
  0x54   : > { %s254_s7 = scalar_lea.vmem [#allocation6], %s551_s28 }
  0x55   : > { %771 = dma.done.wait (%p1078_p8), %s251_s9, 512  }
  0x56   : > { %773 = vsyncadd (%p1078_p8), %s251_s9, 4294966784  ;;  %vm299_vm0 = vcmask 261120   ;;  %v806_v0 = vmov 0.0|0.0   ;;  %v807_v1 = vmov 0.0   ;;  %vm808_vm1 = vmmov 0   ;;  %v302_v2 = vld [vmem:[%s254_s7] sm:$0xff] }
  0x57   : > { %576 = vmatprep.subr.bf16.mxu0 %v806_v0  ;;  %300 = vst.msk [vmem:[#allocation2] sm:$0xff] %vm299_vm0, %v807_v1  ;;  %573 = vmatprep.mubr.msk.f32.mxu0 %vm808_vm1, %v807_v1  ;;  %v303_v3 = vld [vmem:[%s254_s7 + $0x8] sm:$0xff]  ;;  %v304_v4 = vld [vmem:[%s254_s7 + $0x10] sm:$0xff]  ;;  %v305_v6 = vld [vmem:[%s254_s7 + $0x18] sm:$0xff]  ;;  %p289_p13 = scmp.lt.s32.totalorder %s792_s15, 3  ;;  %s556_s11 = sshll.u32 %s792_s15, 7 }
  0x58   : > { %v577_v5 = vpack.c.bf16 %v303_v3, %v302_v2  ;;  %v580_v7 = vpack.c.bf16 %v305_v6, %v304_v4  ;;  %v301_v8 = vld [vmem:[%s245_s18] sm:$0xff]  ;;  %s287_s19 = scalar_lea.vmem [#allocation8], %s550_s4  ;;  %s1015_s10 = scalar_lea.hbm %s1067_s3, %s556_s11 }
  0x59   : > { %s290_s24 = scalar_select %p289_p13, %s792_s15, 3 }
  0x5a   : > { %578 = vmatpush3.bf16.msra.mxu0 %v577_v5  ;;  %s413_s21 = sshll.u32 %s287_s19, 4  ;;  %s398_s5 = scalar_lea.sflag [#allocation5], %s985_s30  ;;  %s1017_s21 = int_to_ptr.vmem [resolvable:$true] %s413_s21 }
  0x5b   : > { %579 = vmatprep.subr.bf16.mxu0 %v806_v0  ;;  %s294_s6 = scalar_lea.vmem %s1066_s2, %s290_s24  ;;  %s714_s18 = scalar_lea.vmem %s1017_s21, 128 }
  0x5c   : > { %v554_v13 = vld [vmem:[%s294_s6] ss:$0 sm:$0xff]  ;;  %p715_p3 = scmp.ne.s32.totalorder %s1017_s21, %s714_s18  ;;  %p1079_p6 = scmp.ne.s32.totalorder %s1072_s25, 0 }
  0x5d   : > { %s809_s15 = smov [#allocation8]  }
  0x5e   : > { %581 = vmatpush3.bf16.msra.mxu0 %v580_v7  ;;  %v306_v9 = vld [vmem:[#allocation2] sm:$0xff]  ;;  %p716_p12 = pnand %p715_p3, %p1079_p6  ;;  %s718_s4 = sshll.u32 %s809_s15, 4  ;;  %s719_s4 = int_to_ptr.vmem [resolvable:$false] %s718_s4 }
  0x5f   : > { %s720_s28 = scalar_lea.vmem %s719_s4, 256  ;;  %p721_p10 = scmp.lt.s32.totalorder %s1017_s21, %s719_s4 }
  0x60   : > { %p717_p7 = pneg %p716_p12  ;;  %p722_p0 = scmp.lt.s32.totalorder %s720_s28, %s714_s18 }
  0x61   : > { %574 = vmatmul.mubr.msk.f32.vlgmr.msra.gmra.mrb[0].mxu0 %vm299_vm0, %v301_v8 }
  0x62   : > { %p723_p1 = por %p722_p0, %p721_p10 }
  0x64   : > { %p724_p9 = pnand %p723_p1, %p717_p7 }
 0x134   : > { %v377_v10 = vpop.f32.mrb[0].mxu0 }
 0x135   : > { %v381_v11 = vadd.f32 %v377_v10, %v306_v9  ;;  %v575_v12 = vpop.f32.mrb[1].mxu0 }
 0x137   : > { %382 = vst.msk [vmem:[#allocation2] sm:$0xff] %vm299_vm0, %v381_v11 }
 0x13e   : > { %v386_v14 = vld [vmem:[#allocation2] sm:$0xff] }
 0x13f   : > { %v394_v15 = vadd.f32 %v554_v13, %v386_v14 }
 0x141   : > { %v395_v16 = vmax.f32 %v394_v15, 0.0 }
 0x143   : > { %396 = vst.msk [vmem:[%s287_s19] sm:$0xff] %vm299_vm0, %v395_v16 }
 0x144   : > { %727 = shalt.err (!%p724_p9)
}
 0x145   : > { %s728_s30 = scalar_lea.hbm %s1015_s10, 128  ;;  %s732_s24 = scalar_lea.hbm %s1067_s3, 512 }
 0x146   : > { %p729_p11 = scmp.ne.s32.totalorder %s1015_s10, %s728_s30  ;;  %p733_p4 = scmp.lt.u32.totalorder %s1015_s10, %s1067_s3 }
 0x147   : > { %p734_p8 = scmp.lt.u32.totalorder %s732_s24, %s728_s30  ;;  %p736_p3 = scmp.lt.u32.totalorder %s728_s30, %s1015_s10 }
 0x148   : > { %p730_p2 = pnand %p729_p11, %p1079_p6 }
 0x149   : > { %p735_p13 = por %p734_p8, %p733_p4 }
 0x14a   : > { %p731_p5 = pneg %p730_p2 }
 0x14b   : > { %p737_p12 = por %p736_p3, %p735_p13 }
 0x14d   : > { %p738_p7 = pnand %p737_p12, %p731_p5 }
 0x14f   : > { %741 = shalt.err (!%p738_p7)
}
 0x150   : > { %586 = dma.vmem_to_hbm [thread:$0]  (%p1079_p6), %s1017_s21, 128, %s1015_s10, %s398_s5  }
 0x151 PF: > { %p600_p10 = scmp.ge.s32.totalorder %s800_s17, 2  ;;  %s425_s6 = sand.u32 1, %s780_s12  }
 0x152   : > { %p1080_p0 = scmp.ne.s32.totalorder %s1073_s27, 0  ;;  %s426_s11 = scalar_lea.sflag [#allocation5], %s425_s6 }
 0x154   : > { %p596_p1 = pnand %p600_p10, %p1080_p0 }
 0x156   : > { %775 = dma.done.wait (!%p596_p1), %s426_s11, 128  }
 0x157   : > { %777 = vsyncadd (!%p596_p1), %s426_s11, 4294967168  ;;  %s22_s17 = sadd.s32 1, %s800_s17   ;;  %s1081_s12 = smov %s784_s13 }
 0x158   : > { %p19_p9 = scmp.ge.s32.totalorder %s22_s17, 6   ;;  %s1082_s13 = smov %s788_s14 }
 0x159   : > { %s1083_s14 = smov %s886_s26  ;;  %s1084_s15 = smov %s796_s16 }
 0x15a   : > { %s1085_s16 = smov %s1087_s20  ;;  %21 = sbr.rel (!%p19_p9) target bundleno = 8 (0x8), region = 101 }
 0x161   :  { %431 = vsyncpa [#allocation4], 1 }
 0x162   :  { %433 = vsyncpa [#allocation4 + $0x1], 1 }
 0x163   :  { %434 = vsyncpa [#allocation7], 1 }
 0x164   :  { %436 = vsyncpa [#allocation7 + $0x1], 1 }
 0x165   :  { %437 = vsyncpa [#allocation5], 1 }
 0x166   :  { %439 = vsyncpa [#allocation5 + $0x1], 1 }

</bundles_post_ra>
